<compile_context>
chip_gen: v5e
topology: v5e:2x2
jax: 0.10.0
libtpu: 0.0.40
codegen_flags: <defaults>
</compile_context>

<pallas_src>
import jax
import jax.numpy as jnp
from jax.experimental import pallas as pl
from jax.experimental.pallas import tpu as pltpu

HIDDEN = 32
LAYERS = 3
NUM_CLASS = 8
EDGE_DIM = 7
EDGE_PAD = 8            # sublane-aligned K for the edge Linear
GRAPH_PAD = 8           # graph axis padded to full sublanes
PRED_PAD = 128          # lane-dense classifier output (sliced to NUM_CLASS outside)
T = 4.0
BN_EPS = 1e-5


def _vmem():
    return pl.BlockSpec(memory_space=pltpu.MemorySpace.VMEM)


def _smem():
    return pl.BlockSpec(memory_space=pltpu.MemorySpace.SMEM)


# ---------------------------------------------------------------------------
# Single fused Pallas kernel: entire VirtualnodeNet forward
# ---------------------------------------------------------------------------
def _fused_forward_kernel(
        eps_ref, alpha_ref,                                    # SMEM scalars
        edge_attr_ref, gsrc_ref, sdst_ref, p_ref, pt_ref,
        node_emb_ref, vn_emb_ref,
        edge_w_ref, edge_b_ref,
        conv_w1_ref, conv_b1_ref, conv_w2_ref, conv_b2_ref,
        vn_w1_ref, vn_b1_ref, vn_w2_ref, vn_b2_ref,
        pred_w_ref, pred_b_ref,
        out_ref):
    f32 = jnp.float32
    n_nodes = gsrc_ref.shape[1]
    n_graphs_pad = pt_ref.shape[0]
    dot = lambda a, b: jnp.dot(a, b, preferred_element_type=f32)

    # node_encoder: ogb-ppa node features are all zeros -> every node takes
    # embedding row 0; broadcast in-register (nothing materialized in HBM).
    x = jnp.broadcast_to(node_emb_ref[...], (n_nodes, HIDDEN))
    # virtualnode_embedding(zeros) -> row 0 broadcast over (padded) graphs.
    vn = jnp.broadcast_to(vn_emb_ref[...], (n_graphs_pad, HIDDEN))

    # One-hot operators arrive as bf16 (exact for 0/1 -> bit-identical after
    # promote); promote once, reuse across all 3 layers.
    gsrc = gsrc_ref[...].astype(f32)   # [E, N ]  gather:   x_j = gsrc @ x
    sdst = sdst_ref[...].astype(f32)   # [N, E ]  scatter_add over dst
    P    = p_ref[...].astype(f32)      # [N, Gp]  vn[batch] = P @ vn
    PT   = pt_ref[...].astype(f32)     # [Gp, N]  global_add_pool

    # Loop-invariant edge Linear, hoisted and batched across layers:
    # edge_attr @ [we_0 | we_1 | we_2]  ->  [E, 3H], one wide MXU push.
    edge_emb_all = dot(edge_attr_ref[...], edge_w_ref[...]) + edge_b_ref[...]

    for i in range(LAYERS):                      # unrolled at trace time
        # xs[i] = xs[i] + vn[batch]
        x = x + dot(P, vn)

        # ---- GinConv: relu(x_j + e) message, scatter_add, (1+eps)*x skip,
        #               Linear -> BN(folded) -> ReLU -> Linear --------------
        edge_emb = edge_emb_all[:, i * HIDDEN:(i + 1) * HIDDEN]     # [E, H]
        x_j = dot(gsrc, x)                                          # [E, H]
        msg = jnp.maximum(x_j + edge_emb, 0.0)
        agg = dot(sdst, msg)                                        # [N, H]
        h = (1.0 + eps_ref[i]) * x + agg
        h = jnp.maximum(dot(h, conv_w1_ref[i]) + conv_b1_ref[i], 0.0)
        h_new = dot(h, conv_w2_ref[i]) + conv_b2_ref[i]

        if i < LAYERS - 1:
            # vn_tmp = global_add_pool(xs[i], batch) + vn   (post-broadcast x!)
            vn_tmp = dot(PT, x) + vn
            # Linear->BN(folded)->PReLU->Linear->BN(folded)->PReLU; dropout=id.
            v = dot(vn_tmp, vn_w1_ref[i]) + vn_b1_ref[i]
            a1 = alpha_ref[2 * i]
            v = jnp.where(v > 0.0, v, a1 * v)
            v = dot(v, vn_w2_ref[i]) + vn_b2_ref[i]
            a2 = alpha_ref[2 * i + 1]
            vn = jnp.where(v > 0.0, v, a2 * v)

        x = h_new

    # JK='last' -> x ; dropout identity; global_add_pool; classifier.
    # 1/T folded into pred_w / pred_b; out dim padded to 128 lanes, graph dim
    # padded to 8 sublanes -> single unmasked (8,128) vreg store.
    h_graph = dot(PT, x)
    out_ref[...] = dot(h_graph, pred_w_ref[...]) + pred_b_ref[...]


# ---------------------------------------------------------------------------
# Wrapper: builds the dense one-hot operators (plain-JAX glue) and launches
# the single fused pallas_call.
# ---------------------------------------------------------------------------
def virtualnode_net_forward(params, edge_attr, src, dst, batch, n_graphs):
    n_nodes = batch.shape[0]
    g_pad = max(GRAPH_PAD, ((n_graphs + 7) // 8) * 8)

    # Zero-pad the edge-feature K dim 7 -> 8 (matching zero row in edge_w).
    edge_attr_p = jnp.pad(edge_attr, ((0, 0), (0, EDGE_PAD - EDGE_DIM)))

    # One-hot gather/scatter/pool operators in bf16 (0/1 exact; half the DMA).
    gsrc = jax.nn.one_hot(src, n_nodes, dtype=jnp.bfloat16)            # [E, N]
    sdst = jax.nn.one_hot(dst, n_nodes, dtype=jnp.bfloat16).T          # [N, E]
    P = jax.nn.one_hot(batch, g_pad, dtype=jnp.bfloat16)               # [N, Gp]
    PT = P.T                                                           # [Gp, N]

    out_pad = pl.pallas_call(
        _fused_forward_kernel,
        out_shape=jax.ShapeDtypeStruct((g_pad, PRED_PAD), jnp.float32),
        in_specs=[_smem(), _smem()] + [_vmem()] * 19,
        out_specs=_vmem(),
        compiler_params=pltpu.CompilerParams(
            # Well under v7x's 64 MiB physical / 32 MiB default scoped VMEM.
            vmem_limit_bytes=32 * 1024 * 1024),
    )(params["eps"], params["alpha"],
      edge_attr_p, gsrc, sdst, P, PT,
      params["node_emb"], params["vn_emb"],
      params["edge_w"], params["edge_b"],
      params["conv_w1"], params["conv_b1"], params["conv_w2"], params["conv_b2"],
      params["vn_w1"], params["vn_b1"], params["vn_w2"], params["vn_b2"],
      params["pred_w"], params["pred_b"])
    return out_pad[:n_graphs, :NUM_CLASS]


# ---------------------------------------------------------------------------
# Parameter construction (deterministic, synthetic; BN / 1/T pre-folded)
# ---------------------------------------------------------------------------
def _linear(key, fan_in, fan_out):
    w = jax.random.normal(key, (fan_in, fan_out), jnp.float32) / jnp.sqrt(
        jnp.float32(fan_in))
    b = jnp.zeros((fan_out,), jnp.float32)
    return w, b


def _fold_bn(w, b, gamma, beta, mean, var):
    """Fold a BatchNorm1d (eval, running stats) into the preceding Linear."""
    scale = gamma / jnp.sqrt(var + BN_EPS)
    return w * scale, (b - mean) * scale + beta


def _default_bn(dim):
    # PyTorch BatchNorm1d defaults: gamma=1, beta=0, running_mean=0, running_var=1.
    return (jnp.ones((dim,), jnp.float32), jnp.zeros((dim,), jnp.float32),
            jnp.zeros((dim,), jnp.float32), jnp.ones((dim,), jnp.float32))


def init_params(key):
    n_keys = 1 + 3 * LAYERS + 2 * (LAYERS - 1) + 1
    keys = jax.random.split(key, n_keys)
    ki = iter(keys)

    node_emb = jax.random.normal(next(ki), (1, HIDDEN), jnp.float32)
    vn_emb = jnp.zeros((1, HIDDEN), jnp.float32)        # constant_(0) init

    edge_ws, edge_bs = [], []
    conv_w1, conv_b1, conv_w2, conv_b2 = [], [], [], []
    for _ in range(LAYERS):
        we, be = _linear(next(ki), EDGE_DIM, HIDDEN)
        we = jnp.pad(we, ((0, EDGE_PAD - EDGE_DIM), (0, 0)))     # zero K-pad row
        edge_ws.append(we)
        edge_bs.append(be)
        w1, b1 = _linear(next(ki), HIDDEN, 2 * HIDDEN)
        w1, b1 = _fold_bn(w1, b1, *_default_bn(2 * HIDDEN))      # BN(2H) folded
        w2, b2 = _linear(next(ki), 2 * HIDDEN, HIDDEN)
        conv_w1.append(w1)
        conv_b1.append(b1.reshape(1, 2 * HIDDEN))
        conv_w2.append(w2)
        conv_b2.append(b2.reshape(1, HIDDEN))

    # Batched loop-invariant edge Linear: [8, 3H] weight, [1, 3H] bias.
    edge_w = jnp.concatenate(edge_ws, axis=1)
    edge_b = jnp.concatenate(edge_bs, axis=0).reshape(1, LAYERS * HIDDEN)

    vn_w1, vn_b1, vn_w2, vn_b2 = [], [], [], []
    for _ in range(LAYERS - 1):
        w1, b1 = _linear(next(ki), HIDDEN, 2 * HIDDEN)
        w1, b1 = _fold_bn(w1, b1, *_default_bn(2 * HIDDEN))      # BN(2H) folded
        w2, b2 = _linear(next(ki), 2 * HIDDEN, HIDDEN)
        w2, b2 = _fold_bn(w2, b2, *_default_bn(HIDDEN))          # BN(H) folded
        vn_w1.append(w1)
        vn_b1.append(b1.reshape(1, 2 * HIDDEN))
        vn_w2.append(w2)
        vn_b2.append(b2.reshape(1, HIDDEN))

    pw, pb = _linear(next(ki), HIDDEN, NUM_CLASS)
    pw = pw / T                                                  # fold 1/T
    pb = pb / T
    pred_w = jnp.pad(pw, ((0, 0), (0, PRED_PAD - NUM_CLASS)))    # lane-dense out
    pred_b = jnp.pad(pb.reshape(1, NUM_CLASS),
                     ((0, 0), (0, PRED_PAD - NUM_CLASS)))

    return dict(
        node_emb=node_emb, vn_emb=vn_emb,
        edge_w=edge_w, edge_b=edge_b,
        conv_w1=jnp.stack(conv_w1), conv_b1=jnp.stack(conv_b1),
        conv_w2=jnp.stack(conv_w2), conv_b2=jnp.stack(conv_b2),
        vn_w1=jnp.stack(vn_w1), vn_b1=jnp.stack(vn_b1),
        vn_w2=jnp.stack(vn_w2), vn_b2=jnp.stack(vn_b2),
        pred_w=pred_w, pred_b=pred_b,
        eps=jnp.zeros((LAYERS,), jnp.float32),                   # GIN eps, init 0
        # PReLU alphas flattened 1D for cheap SMEM padding: [l0_a1, l0_a2, ...].
        alpha=jnp.full((2 * (LAYERS - 1),), 0.25, jnp.float32),
    )


# ---------------------------------------------------------------------------
if __name__ == "__main__":
    key = jax.random.PRNGKey(0)
    k_param, k_src, k_dst, k_eattr = jax.random.split(key, 4)

    N, E, G = 16, 32, 2                        # nodes, edges, graphs

    # Synthetic batched graph (edges kept within each graph).
    batch = jnp.repeat(jnp.arange(G), N // G)                   # [N]
    src_local = jax.random.randint(k_src, (E,), 0, N // G)
    dst_local = jax.random.randint(k_dst, (E,), 0, N // G)
    edge_graph = jnp.repeat(jnp.arange(G), E // G)
    src = src_local + edge_graph * (N // G)
    dst = dst_local + edge_graph * (N // G)
    edge_attr = jax.random.normal(k_eattr, (E, EDGE_DIM), jnp.float32)

    params = init_params(k_param)

    out = virtualnode_net_forward(params, edge_attr, src, dst, batch, G)
    out = jax.block_until_ready(out)
    assert out.shape == (G, NUM_CLASS)
    assert bool(jnp.all(jnp.isfinite(out)))
    print("KERNEL_OK")
</pallas_src>

<mosaic_0001>
module attributes {stable_mosaic.version = 11 : i64} {
  func.func @_fused_forward_kernel(%arg0: memref<3xf32, #tpu.memory_space<smem>>, %arg1: memref<4xf32, #tpu.memory_space<smem>>, %arg2: memref<32x8xf32, #tpu.memory_space<vmem>>, %arg3: memref<32x16xbf16, #tpu.memory_space<vmem>>, %arg4: memref<16x32xbf16, #tpu.memory_space<vmem>>, %arg5: memref<16x8xbf16, #tpu.memory_space<vmem>>, %arg6: memref<8x16xbf16, #tpu.memory_space<vmem>>, %arg7: memref<1x32xf32, #tpu.memory_space<vmem>>, %arg8: memref<1x32xf32, #tpu.memory_space<vmem>>, %arg9: memref<8x96xf32, #tpu.memory_space<vmem>>, %arg10: memref<1x96xf32, #tpu.memory_space<vmem>>, %arg11: memref<3x32x64xf32, #tpu.memory_space<vmem>>, %arg12: memref<3x1x64xf32, #tpu.memory_space<vmem>>, %arg13: memref<3x64x32xf32, #tpu.memory_space<vmem>>, %arg14: memref<3x1x32xf32, #tpu.memory_space<vmem>>, %arg15: memref<2x32x64xf32, #tpu.memory_space<vmem>>, %arg16: memref<2x1x64xf32, #tpu.memory_space<vmem>>, %arg17: memref<2x64x32xf32, #tpu.memory_space<vmem>>, %arg18: memref<2x1x32xf32, #tpu.memory_space<vmem>>, %arg19: memref<32x128xf32, #tpu.memory_space<vmem>>, %arg20: memref<1x128xf32, #tpu.memory_space<vmem>>, %arg21: memref<8x128xf32, #tpu.memory_space<vmem>>) attributes {dimension_semantics = [], scalar_prefetch = 0 : i64, scratch_operands = 0 : i64, tpu.core_type = #tpu.core_type<tc>} {
    %c0 = arith.constant 0 : index
    %c0_0 = arith.constant 0 : index
    %0 = vector.load %arg7[%c0, %c0_0] : memref<1x32xf32, #tpu.memory_space<vmem>>, vector<1x32xf32>
    %1 = vector.shape_cast %0 : vector<1x32xf32> to vector<1x32xf32>
    %2 = vector.broadcast %1 : vector<1x32xf32> to vector<16x32xf32>
    %c0_1 = arith.constant 0 : index
    %c0_2 = arith.constant 0 : index
    %3 = vector.load %arg8[%c0_1, %c0_2] : memref<1x32xf32, #tpu.memory_space<vmem>>, vector<1x32xf32>
    %4 = vector.shape_cast %3 : vector<1x32xf32> to vector<1x32xf32>
    %5 = vector.broadcast %4 : vector<1x32xf32> to vector<8x32xf32>
    %c0_3 = arith.constant 0 : index
    %c0_4 = arith.constant 0 : index
    %6 = vector.load %arg3[%c0_3, %c0_4] : memref<32x16xbf16, #tpu.memory_space<vmem>>, vector<32x16xbf16>
    %7 = arith.extf %6 : vector<32x16xbf16> to vector<32x16xf32>
    %c0_5 = arith.constant 0 : index
    %c0_6 = arith.constant 0 : index
    %8 = vector.load %arg4[%c0_5, %c0_6] : memref<16x32xbf16, #tpu.memory_space<vmem>>, vector<16x32xbf16>
    %9 = arith.extf %8 : vector<16x32xbf16> to vector<16x32xf32>
    %c0_7 = arith.constant 0 : index
    %c0_8 = arith.constant 0 : index
    %10 = vector.load %arg5[%c0_7, %c0_8] : memref<16x8xbf16, #tpu.memory_space<vmem>>, vector<16x8xbf16>
    %11 = arith.extf %10 : vector<16x8xbf16> to vector<16x8xf32>
    %c0_9 = arith.constant 0 : index
    %c0_10 = arith.constant 0 : index
    %12 = vector.load %arg6[%c0_9, %c0_10] : memref<8x16xbf16, #tpu.memory_space<vmem>>, vector<8x16xbf16>
    %13 = arith.extf %12 : vector<8x16xbf16> to vector<8x16xf32>
    %c0_11 = arith.constant 0 : index
    %c0_12 = arith.constant 0 : index
    %14 = vector.load %arg2[%c0_11, %c0_12] : memref<32x8xf32, #tpu.memory_space<vmem>>, vector<32x8xf32>
    %c0_13 = arith.constant 0 : index
    %c0_14 = arith.constant 0 : index
    %15 = vector.load %arg9[%c0_13, %c0_14] : memref<8x96xf32, #tpu.memory_space<vmem>>, vector<8x96xf32>
    %cst = arith.constant dense<0.000000e+00> : vector<32x96xf32>
    %16 = tpu.matmul %14, %15, %cst {dimension_numbers = #tpu.dot_dimension_numbers<[1], [0], [0], [1], [0, 0, 1, 1], [], []>} : vector<32x8xf32>, vector<8x96xf32>, vector<32x96xf32> -> vector<32x96xf32>
    %c0_15 = arith.constant 0 : index
    %c0_16 = arith.constant 0 : index
    %17 = vector.load %arg10[%c0_15, %c0_16] : memref<1x96xf32, #tpu.memory_space<vmem>>, vector<1x96xf32>
    %18 = vector.broadcast %17 : vector<1x96xf32> to vector<32x96xf32>
    %19 = arith.addf %16, %18 : vector<32x96xf32>
    %cst_17 = arith.constant dense<0.000000e+00> : vector<16x32xf32>
    %20 = tpu.matmul %11, %5, %cst_17 {dimension_numbers = #tpu.dot_dimension_numbers<[1], [0], [0], [1], [0, 0, 1, 1], [], []>} : vector<16x8xf32>, vector<8x32xf32>, vector<16x32xf32> -> vector<16x32xf32>
    %21 = arith.addf %2, %20 : vector<16x32xf32>
    %22 = vector.extract_strided_slice %19 {offsets = [0, 0], sizes = [32, 32], strides = [1, 1]} : vector<32x96xf32> to vector<32x32xf32>
    %cst_18 = arith.constant dense<0.000000e+00> : vector<32x32xf32>
    %23 = tpu.matmul %7, %21, %cst_18 {dimension_numbers = #tpu.dot_dimension_numbers<[1], [0], [0], [1], [0, 0, 1, 1], [], []>} : vector<32x16xf32>, vector<16x32xf32>, vector<32x32xf32> -> vector<32x32xf32>
    %24 = arith.addf %23, %22 : vector<32x32xf32>
    %cst_19 = arith.constant 0.000000e+00 : f32
    %25 = vector.broadcast %cst_19 : f32 to vector<32x32xf32>
    %26 = arith.maximumf %24, %25 : vector<32x32xf32>
    %cst_20 = arith.constant dense<0.000000e+00> : vector<16x32xf32>
    %27 = tpu.matmul %9, %26, %cst_20 {dimension_numbers = #tpu.dot_dimension_numbers<[1], [0], [0], [1], [0, 0, 1, 1], [], []>} : vector<16x32xf32>, vector<32x32xf32>, vector<16x32xf32> -> vector<16x32xf32>
    %c0_21 = arith.constant 0 : index
    %28 = memref.load %arg0[%c0_21] : memref<3xf32, #tpu.memory_space<smem>>
    %cst_22 = arith.constant 1.000000e+00 : f32
    %29 = arith.addf %cst_22, %28 : f32
    %30 = vector.broadcast %29 : f32 to vector<16x32xf32>
    %31 = arith.mulf %30, %21 : vector<16x32xf32>
    %32 = arith.addf %31, %27 : vector<16x32xf32>
    %c0_23 = arith.constant 0 : index
    %c0_24 = arith.constant 0 : index
    %c0_25 = arith.constant 0 : index
    %33 = vector.load %arg11[%c0_23, %c0_24, %c0_25] : memref<3x32x64xf32, #tpu.memory_space<vmem>>, vector<1x32x64xf32>
    %34 = vector.shape_cast %33 : vector<1x32x64xf32> to vector<32x64xf32>
    %cst_26 = arith.constant dense<0.000000e+00> : vector<16x64xf32>
    %35 = tpu.matmul %32, %34, %cst_26 {dimension_numbers = #tpu.dot_dimension_numbers<[1], [0], [0], [1], [0, 0, 1, 1], [], []>} : vector<16x32xf32>, vector<32x64xf32>, vector<16x64xf32> -> vector<16x64xf32>
    %c0_27 = arith.constant 0 : index
    %c0_28 = arith.constant 0 : index
    %c0_29 = arith.constant 0 : index
    %36 = vector.load %arg12[%c0_27, %c0_28, %c0_29] : memref<3x1x64xf32, #tpu.memory_space<vmem>>, vector<1x1x64xf32>
    %37 = vector.shape_cast %36 : vector<1x1x64xf32> to vector<1x64xf32>
    %38 = vector.broadcast %37 : vector<1x64xf32> to vector<16x64xf32>
    %39 = arith.addf %35, %38 : vector<16x64xf32>
    %cst_30 = arith.constant 0.000000e+00 : f32
    %40 = vector.broadcast %cst_30 : f32 to vector<16x64xf32>
    %41 = arith.maximumf %39, %40 : vector<16x64xf32>
    %c0_31 = arith.constant 0 : index
    %c0_32 = arith.constant 0 : index
    %c0_33 = arith.constant 0 : index
    %42 = vector.load %arg13[%c0_31, %c0_32, %c0_33] : memref<3x64x32xf32, #tpu.memory_space<vmem>>, vector<1x64x32xf32>
    %43 = vector.shape_cast %42 : vector<1x64x32xf32> to vector<64x32xf32>
    %cst_34 = arith.constant dense<0.000000e+00> : vector<16x32xf32>
    %44 = tpu.matmul %41, %43, %cst_34 {dimension_numbers = #tpu.dot_dimension_numbers<[1], [0], [0], [1], [0, 0, 1, 1], [], []>} : vector<16x64xf32>, vector<64x32xf32>, vector<16x32xf32> -> vector<16x32xf32>
    %c0_35 = arith.constant 0 : index
    %c0_36 = arith.constant 0 : index
    %c0_37 = arith.constant 0 : index
    %45 = vector.load %arg14[%c0_35, %c0_36, %c0_37] : memref<3x1x32xf32, #tpu.memory_space<vmem>>, vector<1x1x32xf32>
    %46 = vector.shape_cast %45 : vector<1x1x32xf32> to vector<1x32xf32>
    %47 = vector.broadcast %46 : vector<1x32xf32> to vector<16x32xf32>
    %48 = arith.addf %44, %47 : vector<16x32xf32>
    %cst_38 = arith.constant dense<0.000000e+00> : vector<8x32xf32>
    %49 = tpu.matmul %13, %21, %cst_38 {dimension_numbers = #tpu.dot_dimension_numbers<[1], [0], [0], [1], [0, 0, 1, 1], [], []>} : vector<8x16xf32>, vector<16x32xf32>, vector<8x32xf32> -> vector<8x32xf32>
    %50 = arith.addf %49, %5 : vector<8x32xf32>
    %c0_39 = arith.constant 0 : index
    %c0_40 = arith.constant 0 : index
    %c0_41 = arith.constant 0 : index
    %51 = vector.load %arg15[%c0_39, %c0_40, %c0_41] : memref<2x32x64xf32, #tpu.memory_space<vmem>>, vector<1x32x64xf32>
    %52 = vector.shape_cast %51 : vector<1x32x64xf32> to vector<32x64xf32>
    %cst_42 = arith.constant dense<0.000000e+00> : vector<8x64xf32>
    %53 = tpu.matmul %50, %52, %cst_42 {dimension_numbers = #tpu.dot_dimension_numbers<[1], [0], [0], [1], [0, 0, 1, 1], [], []>} : vector<8x32xf32>, vector<32x64xf32>, vector<8x64xf32> -> vector<8x64xf32>
    %c0_43 = arith.constant 0 : index
    %c0_44 = arith.constant 0 : index
    %c0_45 = arith.constant 0 : index
    %54 = vector.load %arg16[%c0_43, %c0_44, %c0_45] : memref<2x1x64xf32, #tpu.memory_space<vmem>>, vector<1x1x64xf32>
    %55 = vector.shape_cast %54 : vector<1x1x64xf32> to vector<1x64xf32>
    %56 = vector.broadcast %55 : vector<1x64xf32> to vector<8x64xf32>
    %57 = arith.addf %53, %56 : vector<8x64xf32>
    %c0_46 = arith.constant 0 : index
    %58 = memref.load %arg1[%c0_46] : memref<4xf32, #tpu.memory_space<smem>>
    %cst_47 = arith.constant 0.000000e+00 : f32
    %59 = vector.broadcast %cst_47 : f32 to vector<8x64xf32>
    %60 = arith.cmpf ogt, %57, %59 : vector<8x64xf32>
    %61 = vector.broadcast %58 : f32 to vector<8x64xf32>
    %62 = arith.mulf %61, %57 : vector<8x64xf32>
    %63 = arith.select %60, %57, %62 : vector<8x64xi1>, vector<8x64xf32>
    %c0_48 = arith.constant 0 : index
    %c0_49 = arith.constant 0 : index
    %c0_50 = arith.constant 0 : index
    %64 = vector.load %arg17[%c0_48, %c0_49, %c0_50] : memref<2x64x32xf32, #tpu.memory_space<vmem>>, vector<1x64x32xf32>
    %65 = vector.shape_cast %64 : vector<1x64x32xf32> to vector<64x32xf32>
    %cst_51 = arith.constant dense<0.000000e+00> : vector<8x32xf32>
    %66 = tpu.matmul %63, %65, %cst_51 {dimension_numbers = #tpu.dot_dimension_numbers<[1], [0], [0], [1], [0, 0, 1, 1], [], []>} : vector<8x64xf32>, vector<64x32xf32>, vector<8x32xf32> -> vector<8x32xf32>
    %c0_52 = arith.constant 0 : index
    %c0_53 = arith.constant 0 : index
    %c0_54 = arith.constant 0 : index
    %67 = vector.load %arg18[%c0_52, %c0_53, %c0_54] : memref<2x1x32xf32, #tpu.memory_space<vmem>>, vector<1x1x32xf32>
    %68 = vector.shape_cast %67 : vector<1x1x32xf32> to vector<1x32xf32>
    %69 = vector.broadcast %68 : vector<1x32xf32> to vector<8x32xf32>
    %70 = arith.addf %66, %69 : vector<8x32xf32>
    %c1 = arith.constant 1 : index
    %71 = memref.load %arg1[%c1] : memref<4xf32, #tpu.memory_space<smem>>
    %cst_55 = arith.constant 0.000000e+00 : f32
    %72 = vector.broadcast %cst_55 : f32 to vector<8x32xf32>
    %73 = arith.cmpf ogt, %70, %72 : vector<8x32xf32>
    %74 = vector.broadcast %71 : f32 to vector<8x32xf32>
    %75 = arith.mulf %74, %70 : vector<8x32xf32>
    %76 = arith.select %73, %70, %75 : vector<8x32xi1>, vector<8x32xf32>
    %cst_56 = arith.constant dense<0.000000e+00> : vector<16x32xf32>
    %77 = tpu.matmul %11, %76, %cst_56 {dimension_numbers = #tpu.dot_dimension_numbers<[1], [0], [0], [1], [0, 0, 1, 1], [], []>} : vector<16x8xf32>, vector<8x32xf32>, vector<16x32xf32> -> vector<16x32xf32>
    %78 = arith.addf %48, %77 : vector<16x32xf32>
    %79 = vector.extract_strided_slice %19 {offsets = [0, 32], sizes = [32, 32], strides = [1, 1]} : vector<32x96xf32> to vector<32x32xf32>
    %cst_57 = arith.constant dense<0.000000e+00> : vector<32x32xf32>
    %80 = tpu.matmul %7, %78, %cst_57 {dimension_numbers = #tpu.dot_dimension_numbers<[1], [0], [0], [1], [0, 0, 1, 1], [], []>} : vector<32x16xf32>, vector<16x32xf32>, vector<32x32xf32> -> vector<32x32xf32>
    %81 = arith.addf %80, %79 : vector<32x32xf32>
    %cst_58 = arith.constant 0.000000e+00 : f32
    %82 = vector.broadcast %cst_58 : f32 to vector<32x32xf32>
    %83 = arith.maximumf %81, %82 : vector<32x32xf32>
    %cst_59 = arith.constant dense<0.000000e+00> : vector<16x32xf32>
    %84 = tpu.matmul %9, %83, %cst_59 {dimension_numbers = #tpu.dot_dimension_numbers<[1], [0], [0], [1], [0, 0, 1, 1], [], []>} : vector<16x32xf32>, vector<32x32xf32>, vector<16x32xf32> -> vector<16x32xf32>
    %c1_60 = arith.constant 1 : index
    %85 = memref.load %arg0[%c1_60] : memref<3xf32, #tpu.memory_space<smem>>
    %cst_61 = arith.constant 1.000000e+00 : f32
    %86 = arith.addf %cst_61, %85 : f32
    %87 = vector.broadcast %86 : f32 to vector<16x32xf32>
    %88 = arith.mulf %87, %78 : vector<16x32xf32>
    %89 = arith.addf %88, %84 : vector<16x32xf32>
    %c1_62 = arith.constant 1 : index
    %c0_63 = arith.constant 0 : index
    %c0_64 = arith.constant 0 : index
    %90 = vector.load %arg11[%c1_62, %c0_63, %c0_64] : memref<3x32x64xf32, #tpu.memory_space<vmem>>, vector<1x32x64xf32>
    %91 = vector.shape_cast %90 : vector<1x32x64xf32> to vector<32x64xf32>
    %cst_65 = arith.constant dense<0.000000e+00> : vector<16x64xf32>
    %92 = tpu.matmul %89, %91, %cst_65 {dimension_numbers = #tpu.dot_dimension_numbers<[1], [0], [0], [1], [0, 0, 1, 1], [], []>} : vector<16x32xf32>, vector<32x64xf32>, vector<16x64xf32> -> vector<16x64xf32>
    %c1_66 = arith.constant 1 : index
    %c0_67 = arith.constant 0 : index
    %c0_68 = arith.constant 0 : index
    %93 = vector.load %arg12[%c1_66, %c0_67, %c0_68] : memref<3x1x64xf32, #tpu.memory_space<vmem>>, vector<1x1x64xf32>
    %94 = vector.shape_cast %93 : vector<1x1x64xf32> to vector<1x64xf32>
    %95 = vector.broadcast %94 : vector<1x64xf32> to vector<16x64xf32>
    %96 = arith.addf %92, %95 : vector<16x64xf32>
    %cst_69 = arith.constant 0.000000e+00 : f32
    %97 = vector.broadcast %cst_69 : f32 to vector<16x64xf32>
    %98 = arith.maximumf %96, %97 : vector<16x64xf32>
    %c1_70 = arith.constant 1 : index
    %c0_71 = arith.constant 0 : index
    %c0_72 = arith.constant 0 : index
    %99 = vector.load %arg13[%c1_70, %c0_71, %c0_72] : memref<3x64x32xf32, #tpu.memory_space<vmem>>, vector<1x64x32xf32>
    %100 = vector.shape_cast %99 : vector<1x64x32xf32> to vector<64x32xf32>
    %cst_73 = arith.constant dense<0.000000e+00> : vector<16x32xf32>
    %101 = tpu.matmul %98, %100, %cst_73 {dimension_numbers = #tpu.dot_dimension_numbers<[1], [0], [0], [1], [0, 0, 1, 1], [], []>} : vector<16x64xf32>, vector<64x32xf32>, vector<16x32xf32> -> vector<16x32xf32>
    %c1_74 = arith.constant 1 : index
    %c0_75 = arith.constant 0 : index
    %c0_76 = arith.constant 0 : index
    %102 = vector.load %arg14[%c1_74, %c0_75, %c0_76] : memref<3x1x32xf32, #tpu.memory_space<vmem>>, vector<1x1x32xf32>
    %103 = vector.shape_cast %102 : vector<1x1x32xf32> to vector<1x32xf32>
    %104 = vector.broadcast %103 : vector<1x32xf32> to vector<16x32xf32>
    %105 = arith.addf %101, %104 : vector<16x32xf32>
    %cst_77 = arith.constant dense<0.000000e+00> : vector<8x32xf32>
    %106 = tpu.matmul %13, %78, %cst_77 {dimension_numbers = #tpu.dot_dimension_numbers<[1], [0], [0], [1], [0, 0, 1, 1], [], []>} : vector<8x16xf32>, vector<16x32xf32>, vector<8x32xf32> -> vector<8x32xf32>
    %107 = arith.addf %106, %76 : vector<8x32xf32>
    %c1_78 = arith.constant 1 : index
    %c0_79 = arith.constant 0 : index
    %c0_80 = arith.constant 0 : index
    %108 = vector.load %arg15[%c1_78, %c0_79, %c0_80] : memref<2x32x64xf32, #tpu.memory_space<vmem>>, vector<1x32x64xf32>
    %109 = vector.shape_cast %108 : vector<1x32x64xf32> to vector<32x64xf32>
    %cst_81 = arith.constant dense<0.000000e+00> : vector<8x64xf32>
    %110 = tpu.matmul %107, %109, %cst_81 {dimension_numbers = #tpu.dot_dimension_numbers<[1], [0], [0], [1], [0, 0, 1, 1], [], []>} : vector<8x32xf32>, vector<32x64xf32>, vector<8x64xf32> -> vector<8x64xf32>
    %c1_82 = arith.constant 1 : index
    %c0_83 = arith.constant 0 : index
    %c0_84 = arith.constant 0 : index
    %111 = vector.load %arg16[%c1_82, %c0_83, %c0_84] : memref<2x1x64xf32, #tpu.memory_space<vmem>>, vector<1x1x64xf32>
    %112 = vector.shape_cast %111 : vector<1x1x64xf32> to vector<1x64xf32>
    %113 = vector.broadcast %112 : vector<1x64xf32> to vector<8x64xf32>
    %114 = arith.addf %110, %113 : vector<8x64xf32>
    %c2 = arith.constant 2 : index
    %115 = memref.load %arg1[%c2] : memref<4xf32, #tpu.memory_space<smem>>
    %cst_85 = arith.constant 0.000000e+00 : f32
    %116 = vector.broadcast %cst_85 : f32 to vector<8x64xf32>
    %117 = arith.cmpf ogt, %114, %116 : vector<8x64xf32>
    %118 = vector.broadcast %115 : f32 to vector<8x64xf32>
    %119 = arith.mulf %118, %114 : vector<8x64xf32>
    %120 = arith.select %117, %114, %119 : vector<8x64xi1>, vector<8x64xf32>
    %c1_86 = arith.constant 1 : index
    %c0_87 = arith.constant 0 : index
    %c0_88 = arith.constant 0 : index
    %121 = vector.load %arg17[%c1_86, %c0_87, %c0_88] : memref<2x64x32xf32, #tpu.memory_space<vmem>>, vector<1x64x32xf32>
    %122 = vector.shape_cast %121 : vector<1x64x32xf32> to vector<64x32xf32>
    %cst_89 = arith.constant dense<0.000000e+00> : vector<8x32xf32>
    %123 = tpu.matmul %120, %122, %cst_89 {dimension_numbers = #tpu.dot_dimension_numbers<[1], [0], [0], [1], [0, 0, 1, 1], [], []>} : vector<8x64xf32>, vector<64x32xf32>, vector<8x32xf32> -> vector<8x32xf32>
    %c1_90 = arith.constant 1 : index
    %c0_91 = arith.constant 0 : index
    %c0_92 = arith.constant 0 : index
    %124 = vector.load %arg18[%c1_90, %c0_91, %c0_92] : memref<2x1x32xf32, #tpu.memory_space<vmem>>, vector<1x1x32xf32>
    %125 = vector.shape_cast %124 : vector<1x1x32xf32> to vector<1x32xf32>
    %126 = vector.broadcast %125 : vector<1x32xf32> to vector<8x32xf32>
    %127 = arith.addf %123, %126 : vector<8x32xf32>
    %c3 = arith.constant 3 : index
    %128 = memref.load %arg1[%c3] : memref<4xf32, #tpu.memory_space<smem>>
    %cst_93 = arith.constant 0.000000e+00 : f32
    %129 = vector.broadcast %cst_93 : f32 to vector<8x32xf32>
    %130 = arith.cmpf ogt, %127, %129 : vector<8x32xf32>
    %131 = vector.broadcast %128 : f32 to vector<8x32xf32>
    %132 = arith.mulf %131, %127 : vector<8x32xf32>
    %133 = arith.select %130, %127, %132 : vector<8x32xi1>, vector<8x32xf32>
    %cst_94 = arith.constant dense<0.000000e+00> : vector<16x32xf32>
    %134 = tpu.matmul %11, %133, %cst_94 {dimension_numbers = #tpu.dot_dimension_numbers<[1], [0], [0], [1], [0, 0, 1, 1], [], []>} : vector<16x8xf32>, vector<8x32xf32>, vector<16x32xf32> -> vector<16x32xf32>
    %135 = arith.addf %105, %134 : vector<16x32xf32>
    %136 = vector.extract_strided_slice %19 {offsets = [0, 64], sizes = [32, 32], strides = [1, 1]} : vector<32x96xf32> to vector<32x32xf32>
    %cst_95 = arith.constant dense<0.000000e+00> : vector<32x32xf32>
    %137 = tpu.matmul %7, %135, %cst_95 {dimension_numbers = #tpu.dot_dimension_numbers<[1], [0], [0], [1], [0, 0, 1, 1], [], []>} : vector<32x16xf32>, vector<16x32xf32>, vector<32x32xf32> -> vector<32x32xf32>
    %138 = arith.addf %137, %136 : vector<32x32xf32>
    %cst_96 = arith.constant 0.000000e+00 : f32
    %139 = vector.broadcast %cst_96 : f32 to vector<32x32xf32>
    %140 = arith.maximumf %138, %139 : vector<32x32xf32>
    %cst_97 = arith.constant dense<0.000000e+00> : vector<16x32xf32>
    %141 = tpu.matmul %9, %140, %cst_97 {dimension_numbers = #tpu.dot_dimension_numbers<[1], [0], [0], [1], [0, 0, 1, 1], [], []>} : vector<16x32xf32>, vector<32x32xf32>, vector<16x32xf32> -> vector<16x32xf32>
    %c2_98 = arith.constant 2 : index
    %142 = memref.load %arg0[%c2_98] : memref<3xf32, #tpu.memory_space<smem>>
    %cst_99 = arith.constant 1.000000e+00 : f32
    %143 = arith.addf %cst_99, %142 : f32
    %144 = vector.broadcast %143 : f32 to vector<16x32xf32>
    %145 = arith.mulf %144, %135 : vector<16x32xf32>
    %146 = arith.addf %145, %141 : vector<16x32xf32>
    %c2_100 = arith.constant 2 : index
    %c0_101 = arith.constant 0 : index
    %c0_102 = arith.constant 0 : index
    %147 = vector.load %arg11[%c2_100, %c0_101, %c0_102] : memref<3x32x64xf32, #tpu.memory_space<vmem>>, vector<1x32x64xf32>
    %148 = vector.shape_cast %147 : vector<1x32x64xf32> to vector<32x64xf32>
    %cst_103 = arith.constant dense<0.000000e+00> : vector<16x64xf32>
    %149 = tpu.matmul %146, %148, %cst_103 {dimension_numbers = #tpu.dot_dimension_numbers<[1], [0], [0], [1], [0, 0, 1, 1], [], []>} : vector<16x32xf32>, vector<32x64xf32>, vector<16x64xf32> -> vector<16x64xf32>
    %c2_104 = arith.constant 2 : index
    %c0_105 = arith.constant 0 : index
    %c0_106 = arith.constant 0 : index
    %150 = vector.load %arg12[%c2_104, %c0_105, %c0_106] : memref<3x1x64xf32, #tpu.memory_space<vmem>>, vector<1x1x64xf32>
    %151 = vector.shape_cast %150 : vector<1x1x64xf32> to vector<1x64xf32>
    %152 = vector.broadcast %151 : vector<1x64xf32> to vector<16x64xf32>
    %153 = arith.addf %149, %152 : vector<16x64xf32>
    %cst_107 = arith.constant 0.000000e+00 : f32
    %154 = vector.broadcast %cst_107 : f32 to vector<16x64xf32>
    %155 = arith.maximumf %153, %154 : vector<16x64xf32>
    %c2_108 = arith.constant 2 : index
    %c0_109 = arith.constant 0 : index
    %c0_110 = arith.constant 0 : index
    %156 = vector.load %arg13[%c2_108, %c0_109, %c0_110] : memref<3x64x32xf32, #tpu.memory_space<vmem>>, vector<1x64x32xf32>
    %157 = vector.shape_cast %156 : vector<1x64x32xf32> to vector<64x32xf32>
    %cst_111 = arith.constant dense<0.000000e+00> : vector<16x32xf32>
    %158 = tpu.matmul %155, %157, %cst_111 {dimension_numbers = #tpu.dot_dimension_numbers<[1], [0], [0], [1], [0, 0, 1, 1], [], []>} : vector<16x64xf32>, vector<64x32xf32>, vector<16x32xf32> -> vector<16x32xf32>
    %c2_112 = arith.constant 2 : index
    %c0_113 = arith.constant 0 : index
    %c0_114 = arith.constant 0 : index
    %159 = vector.load %arg14[%c2_112, %c0_113, %c0_114] : memref<3x1x32xf32, #tpu.memory_space<vmem>>, vector<1x1x32xf32>
    %160 = vector.shape_cast %159 : vector<1x1x32xf32> to vector<1x32xf32>
    %161 = vector.broadcast %160 : vector<1x32xf32> to vector<16x32xf32>
    %162 = arith.addf %158, %161 : vector<16x32xf32>
    %cst_115 = arith.constant dense<0.000000e+00> : vector<8x32xf32>
    %163 = tpu.matmul %13, %162, %cst_115 {dimension_numbers = #tpu.dot_dimension_numbers<[1], [0], [0], [1], [0, 0, 1, 1], [], []>} : vector<8x16xf32>, vector<16x32xf32>, vector<8x32xf32> -> vector<8x32xf32>
    %c0_116 = arith.constant 0 : index
    %c0_117 = arith.constant 0 : index
    %164 = vector.load %arg19[%c0_116, %c0_117] : memref<32x128xf32, #tpu.memory_space<vmem>>, vector<32x128xf32>
    %cst_118 = arith.constant dense<0.000000e+00> : vector<8x128xf32>
    %165 = tpu.matmul %163, %164, %cst_118 {dimension_numbers = #tpu.dot_dimension_numbers<[1], [0], [0], [1], [0, 0, 1, 1], [], []>} : vector<8x32xf32>, vector<32x128xf32>, vector<8x128xf32> -> vector<8x128xf32>
    %c0_119 = arith.constant 0 : index
    %c0_120 = arith.constant 0 : index
    %166 = vector.load %arg20[%c0_119, %c0_120] : memref<1x128xf32, #tpu.memory_space<vmem>>, vector<1x128xf32>
    %167 = vector.broadcast %166 : vector<1x128xf32> to vector<8x128xf32>
    %168 = arith.addf %165, %167 : vector<8x128xf32>
    %c0_121 = arith.constant 0 : index
    %c0_122 = arith.constant 0 : index
    %169 = vector.load %arg21[%c0_121, %c0_122] : memref<8x128xf32, #tpu.memory_space<vmem>>, vector<8x128xf32>
    tpu.vector_store %arg21[%c0_121, %c0_122], %168 {strides = array<i32>} : memref<8x128xf32, #tpu.memory_space<vmem>>, vector<8x128xf32>,
    return
  }
}

</mosaic_0001>

<bundles_post_ra>
// kernel: tpu_custom_call.1
= control target key start
LH: loop header
LB: loop body
LE: loop exit
PB: predicated region body
PF: predicated region fallthrough
CT: control target
= control target key end

     0   :  { %s1696_s0 = inlined_call_operand.vmem [shape: f32[3], index: 0, kind: input, shape index: {}]   ;;  %s1697_s1 = inlined_call_operand.vmem [shape: f32[4], index: 1, kind: input, shape index: {}]   ;;  %s1698_s2 = inlined_call_operand.vmem [shape: f32[32,8], index: 2, kind: input, shape index: {}]   ;;  %s1699_s3 = inlined_call_operand.vmem [shape: bf16[32,16], index: 3, kind: input, shape index: {}]   ;;  %s1700_s4 = inlined_call_operand.vmem [shape: bf16[16,32], index: 4, kind: input, shape index: {}]   ;;  %s1701_s5 = inlined_call_operand.vmem [shape: bf16[16,8], index: 5, kind: input, shape index: {}]   ;;  %s1702_s6 = inlined_call_operand.vmem [shape: bf16[8,16], index: 6, kind: input, shape index: {}]   ;;  %s1703_s7 = inlined_call_operand.vmem [shape: f32[1,32], index: 7, kind: input, shape index: {}]   ;;  %s1704_s8 = inlined_call_operand.vmem [shape: f32[1,32], index: 8, kind: input, shape index: {}]   ;;  %s1705_s9 = inlined_call_operand.vmem [shape: f32[8,96], index: 9, kind: input, shape index: {}]   ;;  %s1706_s10 = inlined_call_operand.vmem [shape: f32[1,96], index: 10, kind: input, shape index: {}]   ;;  %s1707_s11 = inlined_call_operand.vmem [shape: f32[3,32,64], index: 11, kind: input, shape index: {}]   ;;  %s1708_s12 = inlined_call_operand.vmem [shape: f32[3,1,64], index: 12, kind: input, shape index: {}]   ;;  %s1709_s13 = inlined_call_operand.vmem [shape: f32[3,64,32], index: 13, kind: input, shape index: {}]   ;;  %s1710_s14 = inlined_call_operand.vmem [shape: f32[3,1,32], index: 14, kind: input, shape index: {}]   ;;  %s1711_s15 = inlined_call_operand.vmem [shape: f32[2,32,64], index: 15, kind: input, shape index: {}]   ;;  %s1712_s16 = inlined_call_operand.vmem [shape: f32[2,1,64], index: 16, kind: input, shape index: {}]   ;;  %s1713_s17 = inlined_call_operand.vmem [shape: f32[2,64,32], index: 17, kind: input, shape index: {}]   ;;  %s1714_s18 = inlined_call_operand.vmem [shape: f32[2,1,32], index: 18, kind: input, shape index: {}]   ;;  %s1715_s19 = inlined_call_operand.vmem [shape: f32[32,128], index: 19, kind: input, shape index: {}]   ;;  %s1716_s20 = inlined_call_operand.vmem [shape: f32[1,128], index: 20, kind: input, shape index: {}]   ;;  %s1717_s21 = inlined_call_operand.hbm [shape: f32[8,128], index: 21, kind: output, shape index: {}]  }
   0x1   :  { %1720 = sst [smem:[#allocation11_spill]] %s1696_s0 }
   0x2   :  { %1721 = sst [smem:[#allocation12_spill]] %s1697_s1 }
   0x3   :  { %1722 = sst [smem:[#allocation13_spill]] %s1698_s2 }
   0x4   :  { %1723 = sst [smem:[#allocation14_spill]] %s1699_s3 }
   0x5   :  { %1724 = sst [smem:[#allocation15_spill]] %s1700_s4 }
   0x6   :  { %1725 = sst [smem:[#allocation16_spill]] %s1701_s5 }
   0x7   :  { %26 = vsyncpa [#allocation4], 0 }
   0x8   :  { %27 = vsyncpa [#allocation6], 0 }
   0x9   :  { %28 = vsyncpa [#allocation3], 0  ;;  %s1726_s26 = sld [smem:[#allocation11_spill]]  ;;  %s1192_s4 = smov [#allocation2]  }
   0xa   :  { %s1727_s29 = sld [smem:[#allocation12_spill]]  ;;  %s1193_s30 = smov [#allocation5]  }
   0xf   :  { %s34_s27 = sshll.u32 %s1726_s26, 4  ;;  %s35_s27 = int_to_ptr.vmem [resolvable:$true] %s34_s27 }
  0x10   :  { %s43_s0 = sshll.u32 %s1727_s29, 4  ;;  %s44_s0 = int_to_ptr.vmem [resolvable:$true] %s43_s0 }
  0x11   :  { %37 = dma.vmem_to_smem %s35_s27, 16, %s1192_s4, [#allocation4]  }
  0x12   :  { %46 = dma.vmem_to_smem %s44_s0, 16, %s1193_s30, [#allocation6]  }
  0x13   :  { %1186 = dma.done.wait [#allocation4], 16  }
  0x14   :  { %1187 = vsyncadd [#allocation4], 4294967280 }
  0x15   :  { %1188 = dma.done.wait [#allocation6], 16  }
  0x16   :  { %1189 = vsyncadd [#allocation6], 4294967280 }
  0x17   :  { %93 = sfence }
  0x18   :  { %v1316_v0 = vld [vmem:[%s1704_s8] ss:$0 sm:$0xff]  ;;  %s1728_s24 = sld [smem:[#allocation16_spill]]  ;;  %vm129_vm0 = vcmask 64512   ;;  %vm202_vm1 = vcmask 130048   ;;  %vm248_vm2 = vcmask 261120  }
  0x19   :  { %v124_v3 = vld [vmem:[%s1705_s9] sm:$0xff]  ;;  %s1729_s3 = sld [smem:[#allocation13_spill]]  ;;  %192 = vmatpush.msra.mxu1 %v1316_v0  ;;  %v288_v46 = vld [vmem:[%s1707_s11 + $0x18] sm:$0xff]  ;;  %v287_v47 = vld [vmem:[%s1707_s11 + $0x10] sm:$0xff]  ;;  %vm336_vm3 = vcmask 523264   ;;  %s1196_s22 = smov [#allocation7]  }
  0x1a   :  { %157 = vmatpush.msra.mxu0 %v124_v3  ;;  %v1125_v11 = vld [vmem:[%s1703_s7] ss:$0 sm:$0xff]  ;;  %s1730_s1 = sld [smem:[#allocation14_spill]]  ;;  %s1194_s7 = smov 96   ;;  %v286_v48 = vld [vmem:[%s1707_s11 + $0x8] sm:$0xff]  ;;  %v392_v50 = vld [vmem:[%s1711_s15 + $0x18] sm:$0xff] }
  0x1b   :  { %v1126_v17 = vld [vmem:[%s1706_s10] ss:$0 sm:$0xff]  ;;  %s1195_s10 = smov 64   ;;  %s1731_s9 = sld [smem:[#allocation15_spill]]  ;;  %311 = vmatpush.msrb.mxu1 %v288_v46  ;;  %v391_v51 = vld [vmem:[%s1711_s15 + $0x10] sm:$0xff]  ;;  %v390_v52 = vld [vmem:[%s1711_s15 + $0x8] sm:$0xff] }
  0x1c   :  { %v118_v31 = vld [vmem:[%s1702_s6] sm:$0xf]  ;;  %v331_v54 = vld [vmem:[%s1709_s13 + $0x38] sm:$0xff]  ;;  %v330_v55 = vld [vmem:[%s1709_s13 + $0x30] sm:$0xff]  ;;  %s420_s25 = sld [smem:[#allocation5]]  ;;  %s994_s23 = sshll.u32 %s1196_s22, 4  ;;  %s995_s23 = int_to_ptr.vmem [resolvable:$true] %s994_s23 }
  0x1d   :  { %v1388_v32 = vunpack.c.l.bf16 %v118_v31  ;;  %312 = vmatpush.msrb.mxu1 %v287_v47  ;;  %v285_v49 = vld [vmem:[%s1707_s11] sm:$0xff]  ;;  %v329_v56 = vld [vmem:[%s1709_s13 + $0x28] sm:$0xff]  ;;  %v327_v58 = vld [vmem:[%s1709_s13 + $0x18] sm:$0xff]  ;;  %s1026_s27 = sld [smem:[#allocation5 + $0x1]] }
  0x1e   :  { %v1115_v1 = vld [vmem:[%s1728_s24] sm:$0xff]   ;;  %s1061_s2 = sld [smem:[#allocation5 + $0x2]] }
  0x1f   :  { %v1321_v2 = vunpack.c.l.bf16 %v1115_v1  ;;  %v120_v4 = vld [vmem:[%s1729_s3] sm:$0xff]  ;;  %v1333_v5 = vunpack.c.h.bf16 %v1115_v1  ;;  %v121_v6 = vld [vmem:[%s1729_s3 + $0x8] sm:$0xff]  ;;  %v122_v7 = vld [vmem:[%s1729_s3 + $0x10] sm:$0xff]  ;;  %313 = vmatpush.msrb.mxu1 %v286_v48 }
  0x20   :  { %1007 = vmatmul.msk.f32.vlgmr.msra.gmra.mxu0 %vm129_vm0, %v120_v4  ;;  %v123_v8 = vld [vmem:[%s1729_s3 + $0x18] sm:$0xff]  ;;  %v1103_v12 = vld [vmem:[%s1730_s1] sm:$0xff]   ;;  %v1118_v22 = vld [vmem:[%s1730_s1 + $0x8] sm:$0xff]   ;;  %s278_s3 = sld [smem:[#allocation2]] }
  0x21   :  { %1011 = vmatmul.msk.f32.vlgmr.msra.gmra.mxu1 %vm129_vm0, %v1321_v2  ;;  %v1357_v15 = vunpack.c.l.bf16 %v1103_v12  ;;  %v1370_v20 = vunpack.c.h.bf16 %v1103_v12  ;;  %v1377_v23 = vunpack.c.l.bf16 %v1118_v22  ;;  %v1381_v24 = vunpack.c.h.bf16 %v1118_v22  ;;  %v1111_v41 = vld [vmem:[%s1731_s9] sm:$0xff]  }
  0x22   :  { %v1395_v43 = vunpack.c.l.bf16 %v1111_v41  ;;  %v1399_v45 = vunpack.c.h.bf16 %v1111_v41  ;;  %314 = vmatpush.msrb.mxu1 %v285_v49  ;;  %v389_v53 = vld [vmem:[%s1711_s15] sm:$0xff] }
  0x23   :  { %v328_v57 = vld [vmem:[%s1709_s13 + $0x20] sm:$0xff] }
  0x24   :  { %412 = vmatpush.msra.mxu1 %v392_v50  ;;  %v429_v12 = vld [vmem:[%s1713_s17 + $0x20] sm:$0xff] }
  0x25   :  { %v1129_v46 = vld [vmem:[%s1710_s14] ss:$0 sm:$0xff] }
  0x26   :  { %413 = vmatpush.msra.mxu1 %v391_v51  ;;  %s279_s5 = sadd.f32 1.0, %s278_s3 }
  0x28   :  { %1008 = vmatmul.msk.f32.gmra.mxu0 %vm129_vm0, %v121_v6  ;;  %414 = vmatpush.msra.mxu1 %v390_v52  ;;  %v280_v59 = vstv %s279_s5 }
  0x29   :  { %1012 = vmatmul.msk.f32.gmra.mxu1 %vm129_vm0, %v1333_v5 }
  0x2a   :  { %415 = vmatpush.msra.mxu1 %v389_v53 }
  0x30   :  { %1009 = vmatmul.msk.f32.gmra.mxu0 %vm129_vm0, %v122_v7  ;;  %v326_v7 = vld [vmem:[%s1709_s13 + $0x10] sm:$0xff] }
  0x38   :  { %1010 = vmatmul.msk.f32.gmra.mxu0 %vm129_vm0, %v123_v8  ;;  %v325_v8 = vld [vmem:[%s1709_s13 + $0x8] sm:$0xff] }
  0x9d   :  { %v159_v10 = vpop.f32.mrf.mxu0 }
  0x9e   :  { %v194_v9 = vpop.f32.mrf.mxu1  ;;  %v160_v21 = vadd.f32 %v1126_v17, %v159_v10  ;;  %v431_v10 = vld [vmem:[%s1713_s17 + $0x30] sm:$0xff] }
  0x9f   :  { %v1359_v16 = vadd.f32 %v1125_v11, %v194_v9  ;;  %v324_v9 = vld [vmem:[%s1709_s13] sm:$0xff] }
  0xa1   :  { %v281_v60 = vmul.f32 %v280_v59, %v1359_v16 }
  0xa5   :  { %v162_v18 = vpop.f32.mrf.mxu0 }
  0xa6   :  { %v197_v13 = vpop.f32.mrf.mxu1  ;;  %v163_v19 = vadd.f32 %v1126_v17, %v162_v18  ;;  %v1127_v18 = vld [vmem:[%s1708_s12] ss:$0 sm:$0xff] }
  0xa7   :  { %v1355_v14 = vadd.f32 %v1125_v11, %v197_v13  ;;  %v430_v11 = vld [vmem:[%s1713_s17 + $0x28] sm:$0xff]  ;;  %v428_v13 = vld [vmem:[%s1713_s17 + $0x18] sm:$0xff] }
  0xa8   :  { %496 = vrot.lane.b32.xlu1 %v163_v19, %s1194_s7 }
  0xa9   :  { %229 = vmatpush.msra.mxu2 %v1355_v14  ;;  %383 = vmatpush.msrb.mxu0 %v1355_v14  ;;  %v282_v63 = vmul.f32 %v280_v59, %v1355_v14  ;;  %v427_v14 = vld [vmem:[%s1713_s17 + $0x10] sm:$0xff] }
  0xab   :  { %230 = vmatpush.msra.mxu2 %v1359_v16  ;;  %384 = vmatpush.msrb.mxu0 %v1359_v16  ;;  %v426_v16 = vld [vmem:[%s1713_s17 + $0x8] sm:$0xff] }
  0xac   :  { %1013 = vmatmul.msk.f32.vlgmr.msra.gmra.mxu2 %vm202_vm1, %v1357_v15  ;;  %1023 = vmatmul.msk.f32.vlgmr.msrb.gmra.mxu0 %vm202_vm1, %v1388_v32 }
  0xad   :  { %v165_v25 = vpop.f32.mrf.mxu0 }
  0xae   :  { %v166_v28 = vadd.f32 %v1126_v17, %v165_v25 }
  0xb0   :  { %494 = vrot.lane.b32.xlu1 %v160_v21, %s1194_s7 }
  0xb4   :  { %1014 = vmatmul.msk.f32.gmra.mxu2 %vm202_vm1, %v1370_v20 }
  0xb5   :  { %v168_v26 = vpop.f32.mrf.mxu0 }
  0xb6   :  { %v169_v27 = vadd.f32 %v1126_v17, %v168_v26  ;;  %v425_v17 = vld [vmem:[%s1713_s17] sm:$0xff] }
  0xb8   :  { %778 = vrot.lane.b32.xlu1 %v160_v21, %s1195_s10  ;;  %500 = vrot.lane.b32.xlu0 %v169_v27, %s1194_s7 }
  0xb9   :  { %784 = vrot.lane.b32.xlu2 %v169_v27, %s1195_s10 }
  0xbc   :  { %1015 = vmatmul.msk.f32.gmra.mxu2 %vm202_vm1, %v1377_v23 }
  0xc0   :  { %498 = vrot.lane.b32.xlu0 %v166_v28, %s1194_s7 }
  0xc1   :  { %782 = vrot.lane.b32.xlu2 %v166_v28, %s1195_s10 }
  0xc4   :  { %1016 = vmatmul.msk.f32.gmra.mxu2 %vm202_vm1, %v1381_v24 }
  0xc8   :  { %780 = vrot.lane.b32.xlu0 %v163_v19, %s1195_s10 }
 0x129   :  { %v386_v4 = vpop.f32.mrf.mxu0 }
 0x12a   :  { %v387_v6 = vadd.f32 %v1316_v0, %v386_v4  ;;  %v432_v0 = vld [vmem:[%s1713_s17 + $0x38] sm:$0xff] }
 0x12b   :  { %448 = vmatpush.msrb.mxu2 %v432_v0  ;;  %v1036_v0 = vld [vmem:[%s1707_s11 + $0x20] sm:$0xff] }
 0x12d   :  { %449 = vmatpush.msrb.mxu2 %v431_v10  ;;  %v1058_v10 = vld [vmem:[%s1711_s15 + $0x38] sm:$0xff] }
 0x12f   :  { %v232_v29 = vpop.f32.mrf.mxu2  ;;  %450 = vmatpush.msrb.mxu2 %v430_v11  ;;  %v1057_v11 = vld [vmem:[%s1711_s15 + $0x30] sm:$0xff] }
 0x130   :  { %v233_v39 = vadd.f32 %v232_v29, %v160_v21 }
 0x131   :  { %451 = vmatpush.msrb.mxu2 %v429_v12  ;;  %v1056_v12 = vld [vmem:[%s1711_s15 + $0x28] sm:$0xff] }
 0x132   :  { %v244_v44 = vmax.f32 %v233_v39, 0.0 }
 0x133   :  { %452 = vmatpush.msrb.mxu2 %v428_v13  ;;  %v1055_v13 = vld [vmem:[%s1711_s15 + $0x20] sm:$0xff] }
 0x135   :  { %453 = vmatpush.msrb.mxu2 %v427_v14  ;;  %v1050_v14 = vld [vmem:[%s1709_s13 + $0x78] sm:$0xff] }
 0x137   :  { %v235_v30 = vpop.f32.mrf.mxu2  ;;  %454 = vmatpush.msrb.mxu2 %v426_v16  ;;  %v1049_v16 = vld [vmem:[%s1709_s13 + $0x70] sm:$0xff] }
 0x138   :  { %v236_v37 = vadd.f32 %v235_v30, %v163_v19  ;;  %v422_v30 = vstv %s420_s25  ;;  %s1035_s25 = sld [smem:[#allocation2 + $0x1]] }
 0x139   :  { %455 = vmatpush.msrb.mxu2 %v425_v17  ;;  %v1048_v17 = vld [vmem:[%s1709_s13 + $0x68] sm:$0xff] }
 0x13a   :  { %v245_v42 = vmax.f32 %v236_v37, 0.0  ;;  %v462_v37 = vstv %s1026_s27 }
 0x13e   :  { %s563_s15 = sadd.f32 1.0, %s1035_s25 }
 0x13f   :  { %v238_v33 = vpop.f32.mrf.mxu2 }
 0x140   :  { %v239_v35 = vadd.f32 %v238_v33, %v166_v28  ;;  %v1128_v28 = vld [vmem:[%s1712_s16] ss:$0 sm:$0xff] }
 0x142   :  { %v246_v40 = vmax.f32 %v239_v35, 0.0  ;;  %v1130_v35 = vld [vmem:[%s1714_s18] ss:$0 sm:$0xff] }
 0x147   :  { %v241_v34 = vpop.f32.mrf.mxu2 }
 0x148   :  { %v242_v36 = vadd.f32 %v241_v34, %v169_v27 }
 0x14a   :  { %v247_v38 = vmax.f32 %v242_v36, 0.0 }
 0x14c   :  { %267 = vmatpush.msra.mxu3 %v247_v38 }
 0x14e   :  { %268 = vmatpush.msra.mxu3 %v246_v40 }
 0x150   :  { %269 = vmatpush.msra.mxu3 %v245_v42 }
 0x152   :  { %270 = vmatpush.msra.mxu3 %v244_v44 }
 0x153   :  { %1017 = vmatmul.msk.f32.vlgmr.msra.gmra.mxu3 %vm248_vm2, %v1395_v43 }
 0x154   :  { %351 = vmatpush.msrb.mxu3 %v331_v54  ;;  %v501_v54 = vpop.permute.xlu0 %500 }
 0x156   :  { %352 = vmatpush.msrb.mxu3 %v330_v55 }
 0x158   :  { %353 = vmatpush.msrb.mxu3 %v329_v56  ;;  %v497_v56 = vpop.permute.xlu1 %496 }
 0x15a   :  { %354 = vmatpush.msrb.mxu3 %v328_v57  ;;  %v1039_v57 = vld [vmem:[%s1707_s11 + $0x38] sm:$0xff] }
 0x15b   :  { %1018 = vmatmul.msk.f32.gmra.mxu3 %vm248_vm2, %v1399_v45  ;;  %597 = vmatpush.msra.mxu2 %v1039_v57 }
 0x15c   :  { %355 = vmatpush.msrb.mxu3 %v327_v58  ;;  %v1038_v58 = vld [vmem:[%s1707_s11 + $0x30] sm:$0xff]  ;;  %v499_v59 = vpop.permute.xlu0 %498 }
 0x15d   :  { %598 = vmatpush.msra.mxu2 %v1038_v58 }
 0x15e   :  { %356 = vmatpush.msrb.mxu3 %v326_v7 }
 0x160   :  { %357 = vmatpush.msrb.mxu3 %v325_v8 }
 0x162   :  { %358 = vmatpush.msrb.mxu3 %v324_v9  ;;  %v1037_v9 = vld [vmem:[%s1707_s11 + $0x28] sm:$0xff] }
 0x163   :  { %599 = vmatpush.msra.mxu2 %v1037_v9 }
 0x165   :  { %600 = vmatpush.msra.mxu2 %v1036_v0 }
 0x1d6   :  { %v272_v61 = vpop.f32.mrf.mxu3 }
 0x1d7   :  { %v283_v62 = vadd.f32 %v281_v60, %v272_v61 }
 0x1d9   :  { %1019 = vmatmul.msk.f32.vlgmr.msrb.gmra.mxu1 %vm248_vm2, %v283_v62 }
 0x1de   :  { %v275_v1 = vpop.f32.mrf.mxu3 }
 0x1df   :  { %v284_v3 = vadd.f32 %v282_v63, %v275_v1 }
 0x1e1   :  { %1020 = vmatmul.msk.f32.gmra.mxu1 %vm248_vm2, %v284_v3  ;;  %v495_v3 = vpop.permute.xlu1 %494 }
 0x1e9   :  { %1024 = vmatmul.msk.f32.vlgmr.msra.gmra.mxu1 %vm248_vm2, %v387_v6 }
 0x256   :  { %v316_v19 = vpop.f32.mrf.mxu1 }
 0x257   :  { %v317_v21 = vadd.f32 %v1127_v18, %v316_v19  ;;  %v1046_v19 = vld [vmem:[%s1709_s13 + $0x58] sm:$0xff] }
 0x259   :  { %v322_v22 = vmax.f32 %v317_v21, 0.0  ;;  %v564_v21 = vstv %s563_s15 }
 0x25b   :  { %1021 = vmatmul.msk.f32.vlgmr.msrb.gmra.mxu3 %vm336_vm3, %v322_v22 }
 0x25e   :  { %v319_v25 = vpop.f32.mrf.mxu1 }
 0x25f   :  { %v320_v26 = vadd.f32 %v1127_v18, %v319_v25  ;;  %v1047_v18 = vld [vmem:[%s1709_s13 + $0x60] sm:$0xff] }
 0x261   :  { %v323_v27 = vmax.f32 %v320_v26, 0.0 }
 0x263   :  { %1022 = vmatmul.msk.f32.gmra.mxu3 %vm336_vm3, %v323_v27 }
 0x266   :  { %v417_v29 = vpop.f32.mrf.mxu1 }
 0x267   :  { %v418_v31 = vadd.f32 %v1128_v28, %v417_v29 }
 0x269   :  { %vm421_vm4 = vcmp.gt.f32.partialorder %v418_v31, 0.0  ;;  %v423_v33 = vmul.f32 %v422_v30, %v418_v31 }
 0x26b   :  { %v424_v34 = vsel %vm421_vm4, %v418_v31, %v423_v33  ;;  %v1045_v33 = vld [vmem:[%s1709_s13 + $0x50] sm:$0xff] }
 0x26c   :  { %1025 = vmatmul.msk.f32.vlgmr.msrb.gmra.mxu2 %vm336_vm3, %v424_v34  ;;  %v1044_v34 = vld [vmem:[%s1709_s13 + $0x48] sm:$0xff] }
 0x26d   :  { %698 = vmatpush.msrb.mxu2 %v1058_v10 }
 0x26f   :  { %699 = vmatpush.msrb.mxu2 %v1057_v11 }
 0x271   :  { %700 = vmatpush.msrb.mxu2 %v1056_v12  ;;  %v1085_v12 = vld [vmem:[%s1707_s11 + $0x58] sm:$0xff] }
 0x273   :  { %701 = vmatpush.msrb.mxu2 %v1055_v13  ;;  %v1084_v13 = vld [vmem:[%s1707_s11 + $0x50] sm:$0xff] }
 0x2de   :  { %v360_v41 = vpop.f32.mrf.mxu3 }
 0x2df   :  { %v361_v49 = vadd.f32 %v1129_v46, %v360_v41  ;;  %v1064_v41 = vld [vmem:[%s1713_s17 + $0x50] sm:$0xff] }
 0x2e6   :  { %v363_v42 = vpop.f32.mrf.mxu3 }
 0x2e7   :  { %v364_v47 = vadd.f32 %v1129_v46, %v363_v42  ;;  %v1063_v42 = vld [vmem:[%s1713_s17 + $0x48] sm:$0xff]  ;;  %v1131_v46 = vld [vmem:[%s1708_s12 + $0x1] ss:$0 sm:$0xff] }
 0x2ef   :  { %v457_v36 = vpop.f32.mrf.mxu2 }
 0x2f0   :  { %v458_v38 = vadd.f32 %v1130_v35, %v457_v36  ;;  %v1043_v35 = vld [vmem:[%s1709_s13 + $0x40] sm:$0xff]  ;;  %v1069_v36 = vld [vmem:[%s1713_s17 + $0x78] sm:$0xff] }
 0x2f2   :  { %vm461_vm5 = vcmp.gt.f32.partialorder %v458_v38, 0.0  ;;  %v463_v39 = vmul.f32 %v462_v37, %v458_v38  ;;  %v1068_v37 = vld [vmem:[%s1713_s17 + $0x70] sm:$0xff] }
 0x2f4   :  { %v1493_v40 = vsel %vm461_vm5, %v458_v38, %v463_v39  ;;  %v1067_v38 = vld [vmem:[%s1713_s17 + $0x68] sm:$0xff]  ;;  %v1066_v39 = vld [vmem:[%s1713_s17 + $0x60] sm:$0xff] }
 0x2f5   :  { %480 = vmatpush.msra.mxu3 %v1493_v40 }
 0x2f6   :  { %1027 = vmatmul.msk.f32.vlgmr.msra.gmra.mxu3 %vm129_vm0, %v1321_v2 }
 0x2f7   :  { %638 = vmatpush.msrb.mxu3 %v1050_v14 }
 0x2f9   :  { %639 = vmatpush.msrb.mxu3 %v1049_v16 }
 0x2fb   :  { %640 = vmatpush.msrb.mxu3 %v1048_v17 }
 0x2fd   :  { %641 = vmatpush.msrb.mxu3 %v1047_v18  ;;  %v781_v18 = vpop.permute.xlu0 %780 }
 0x2fe   :  { %1028 = vmatmul.msk.f32.gmra.mxu3 %vm129_vm0, %v1333_v5 }
 0x2ff   :  { %642 = vmatpush.msrb.mxu3 %v1046_v19 }
 0x301   :  { %643 = vmatpush.msrb.mxu3 %v1045_v33  ;;  %v1092_v33 = vld [vmem:[%s1709_s13 + $0x98] sm:$0xff] }
 0x303   :  { %644 = vmatpush.msrb.mxu3 %v1044_v34 }
 0x305   :  { %645 = vmatpush.msrb.mxu3 %v1043_v35 }
 0x307   :  { %736 = vmatpush.msra.mxu3 %v1069_v36 }
 0x309   :  { %737 = vmatpush.msra.mxu3 %v1068_v37 }
 0x30b   :  { %738 = vmatpush.msra.mxu3 %v1067_v38 }
 0x30d   :  { %739 = vmatpush.msra.mxu3 %v1066_v39 }
 0x379   :  { %v482_v44 = vpop.f32.mrf.mxu3 }
 0x37a   :  { %v488_v51 = vadd.f32 %v482_v44, %v361_v49  ;;  %v1062_v44 = vld [vmem:[%s1713_s17 + $0x40] sm:$0xff] }
 0x37c   :  { %v565_v22 = vmul.f32 %v564_v21, %v488_v51 }
 0x381   :  { %v485_v48 = vpop.f32.mrf.mxu3 }
 0x382   :  { %v1503_v50 = vadd.f32 %v485_v48, %v364_v47 }
 0x384   :  { %520 = vmatpush.msra.mxu0 %v1503_v50  ;;  %v566_v27 = vmul.f32 %v564_v21, %v1503_v50  ;;  %v779_v21 = vpop.permute.xlu1 %778 }
 0x386   :  { %521 = vmatpush.msra.mxu0 %v488_v51 }
 0x387   :  { %1029 = vmatmul.msk.f32.vlgmr.msra.gmra.mxu0 %vm202_vm1, %v1357_v15 }
 0x38f   :  { %1030 = vmatmul.msk.f32.gmra.mxu0 %vm202_vm1, %v1370_v20 }
 0x397   :  { %1031 = vmatmul.msk.f32.gmra.mxu0 %vm202_vm1, %v1377_v23 }
 0x39f   :  { %1032 = vmatmul.msk.f32.gmra.mxu0 %vm202_vm1, %v1381_v24 }
 0x404   :  { %v523_v52 = vpop.f32.mrf.mxu0 }
 0x405   :  { %v524_v4 = vadd.f32 %v523_v52, %v495_v3 }
 0x407   :  { %v535_v8 = vmax.f32 %v524_v4, 0.0 }
 0x40c   :  { %v526_v53 = vpop.f32.mrf.mxu0 }
 0x40d   :  { %v527_v63 = vadd.f32 %v526_v53, %v497_v56  ;;  %v1132_v53 = vld [vmem:[%s1712_s16 + $0x1] ss:$0 sm:$0xff] }
 0x40f   :  { %v536_v7 = vmax.f32 %v527_v63, 0.0 }
 0x414   :  { %v529_v55 = vpop.f32.mrf.mxu0 }
 0x415   :  { %v530_v61 = vadd.f32 %v529_v55, %v499_v59  ;;  %v708_v55 = vstv %s1061_s2 }
 0x417   :  { %v537_v6 = vmax.f32 %v530_v61, 0.0  ;;  %v1134_v61 = vld [vmem:[%s1714_s18 + $0x1] ss:$0 sm:$0xff] }
 0x41c   :  { %v532_v60 = vpop.f32.mrf.mxu0 }
 0x41d   :  { %v533_v62 = vadd.f32 %v532_v60, %v501_v54 }
 0x41f   :  { %v538_v1 = vmax.f32 %v533_v62, 0.0 }
 0x421   :  { %551 = vmatpush.msrb.mxu1 %v538_v1 }
 0x423   :  { %552 = vmatpush.msrb.mxu1 %v537_v6 }
 0x425   :  { %553 = vmatpush.msrb.mxu1 %v536_v7  ;;  %v1133_v7 = vld [vmem:[%s1710_s14 + $0x1] ss:$0 sm:$0xff] }
 0x427   :  { %554 = vmatpush.msrb.mxu1 %v535_v8 }
 0x428   :  { %1033 = vmatmul.msk.f32.vlgmr.msrb.gmra.mxu1 %vm248_vm2, %v1395_v43 }
 0x429   :  { %667 = vmatpush.msra.mxu1 %v1503_v50 }
 0x42b   :  { %668 = vmatpush.msra.mxu1 %v488_v51 }
 0x430   :  { %1034 = vmatmul.msk.f32.gmra.mxu1 %vm248_vm2, %v1399_v45 }
 0x438   :  { %1054 = vmatmul.msk.f32.vlgmr.msra.gmra.mxu1 %vm202_vm1, %v1388_v32 }
 0x4a5   :  { %v556_v25 = vpop.f32.mrf.mxu1 }
 0x4a6   :  { %v567_v26 = vadd.f32 %v565_v22, %v556_v25 }
 0x4a8   :  { %1041 = vmatmul.msk.f32.vlgmr.msra.gmra.mxu2 %vm248_vm2, %v567_v26 }
 0x4ad   :  { %v559_v28 = vpop.f32.mrf.mxu1 }
 0x4ae   :  { %v568_v29 = vadd.f32 %v566_v27, %v559_v28  ;;  %v1083_v28 = vld [vmem:[%s1707_s11 + $0x48] sm:$0xff] }
 0x4b0   :  { %1042 = vmatmul.msk.f32.gmra.mxu2 %vm248_vm2, %v568_v29  ;;  %v1082_v29 = vld [vmem:[%s1707_s11 + $0x40] sm:$0xff]  ;;  %s1081_s11 = sld [smem:[#allocation2 + $0x2]] }
 0x4b5   :  { %v670_v30 = vpop.f32.mrf.mxu1 }
 0x4b6   :  { %v671_v31 = vadd.f32 %v670_v30, %v1493_v40  ;;  %v1065_v40 = vld [vmem:[%s1713_s17 + $0x58] sm:$0xff]  ;;  %s1072_s17 = sld [smem:[#allocation5 + $0x3]] }
 0x4b7   :  { %740 = vmatpush.msra.mxu3 %v1065_v40  ;;  %v1096_v30 = vld [vmem:[%s1709_s13 + $0xb8] sm:$0xff]  ;;  %s847_s25 = sadd.f32 1.0, %s1081_s11 }
 0x4b8   :  { %1060 = vmatmul.msk.f32.vlgmr.msrb.gmra.mxu2 %vm248_vm2, %v671_v31  ;;  %v1093_v31 = vld [vmem:[%s1709_s13 + $0xa0] sm:$0xff] }
 0x4b9   :  { %741 = vmatpush.msra.mxu3 %v1064_v41  ;;  %v848_v34 = vstv %s847_s25  ;;  %v1091_v41 = vld [vmem:[%s1709_s13 + $0x90] sm:$0xff] }
 0x4bb   :  { %742 = vmatpush.msra.mxu3 %v1063_v42  ;;  %v1090_v42 = vld [vmem:[%s1709_s13 + $0x88] sm:$0xff] }
 0x4bc   :  { %v750_v63 = vstv %s1072_s17 }
 0x4bd   :  { %743 = vmatpush.msra.mxu3 %v1062_v44  ;;  %v1089_v44 = vld [vmem:[%s1709_s13 + $0x80] sm:$0xff] }
 0x52b   :  { %v602_v47 = vpop.f32.mrf.mxu2 }
 0x52c   :  { %v603_v48 = vadd.f32 %v1131_v46, %v602_v47 }
 0x52e   :  { %v608_v49 = vmax.f32 %v603_v48, 0.0 }
 0x530   :  { %1052 = vmatmul.msk.f32.vlgmr.msrb.gmra.mxu3 %vm336_vm3, %v608_v49 }
 0x531   :  { %881 = vmatpush.msrb.mxu3 %v1085_v12 }
 0x533   :  { %v605_v50 = vpop.f32.mrf.mxu2  ;;  %882 = vmatpush.msrb.mxu3 %v1084_v13 }
 0x534   :  { %v606_v51 = vadd.f32 %v1131_v46, %v605_v50  ;;  %v1135_v46 = vld [vmem:[%s1708_s12 + $0x2] ss:$0 sm:$0xff] }
 0x535   :  { %883 = vmatpush.msrb.mxu3 %v1083_v28 }
 0x536   :  { %v609_v52 = vmax.f32 %v606_v51, 0.0 }
 0x537   :  { %884 = vmatpush.msrb.mxu3 %v1082_v29 }
 0x538   :  { %1053 = vmatmul.msk.f32.gmra.mxu3 %vm336_vm3, %v609_v52 }
 0x53b   :  { %v703_v54 = vpop.f32.mrf.mxu2 }
 0x53c   :  { %v704_v56 = vadd.f32 %v1132_v53, %v703_v54  ;;  %v960_v53 = vld [vmem:[%s1715_s19 + $0x18] sm:$0xff]  ;;  %v959_v54 = vld [vmem:[%s1715_s19 + $0x10] sm:$0xff] }
 0x53e   :  { %vm707_vm6 = vcmp.gt.f32.partialorder %v704_v56, 0.0  ;;  %v709_v57 = vmul.f32 %v708_v55, %v704_v56  ;;  %v958_v55 = vld [vmem:[%s1715_s19 + $0x8] sm:$0xff] }
 0x540   :  { %v710_v58 = vsel %vm707_vm6, %v704_v56, %v709_v57  ;;  %v957_v56 = vld [vmem:[%s1715_s19] sm:$0xff] }
 0x541   :  { %1071 = vmatmul.msk.f32.vlgmr.msra.gmra.mxu3 %vm336_vm3, %v710_v58  ;;  %v1136_v58 = vld [vmem:[%s1710_s14 + $0x2] ss:$0 sm:$0xff]  ;;  %s996_s14 = sshll.u32 %s1717_s21, 4  ;;  %s997_s14 = int_to_ptr.hbm [resolvable:$true] %s996_s14 }
 0x542   :  { %980 = vmatpush.msra.mxu3 %v960_v53 }
 0x544   :  { %981 = vmatpush.msra.mxu3 %v959_v54 }
 0x546   :  { %982 = vmatpush.msra.mxu3 %v958_v55 }
 0x548   :  { %983 = vmatpush.msra.mxu3 %v957_v56 }
 0x5b3   :  { %v647_v59 = vpop.f32.mrf.mxu3 }
 0x5b4   :  { %v648_v0 = vadd.f32 %v1133_v7, %v647_v59 }
 0x5bb   :  { %v650_v60 = vpop.f32.mrf.mxu3 }
 0x5bc   :  { %v651_v8 = vadd.f32 %v1133_v7, %v650_v60 }
 0x5c4   :  { %v745_v62 = vpop.f32.mrf.mxu3 }
 0x5c5   :  { %v746_v1 = vadd.f32 %v1134_v61, %v745_v62 }
 0x5c7   :  { %vm749_vm7 = vcmp.gt.f32.partialorder %v746_v1, 0.0  ;;  %v751_v3 = vmul.f32 %v750_v63, %v746_v1  ;;  %v1137_v63 = vld [vmem:[%s1716_s20] ss:$0 sm:$0xff] }
 0x5c9   :  { %v752_v4 = vsel %vm749_vm7, %v746_v1, %v751_v3 }
 0x5ca   :  { %768 = vmatpush.msrb.mxu1 %v752_v4 }
 0x5cb   :  { %1073 = vmatmul.msk.f32.vlgmr.msrb.gmra.mxu1 %vm129_vm0, %v1321_v2 }
 0x5cc   :  { %922 = vmatpush.msra.mxu1 %v1096_v30 }
 0x5d3   :  { %1074 = vmatmul.msk.f32.gmra.mxu1 %vm129_vm0, %v1333_v5 }
 0x648   :  { %v770_v6 = vpop.f32.mrf.mxu1 }
 0x649   :  { %v776_v11 = vadd.f32 %v770_v6, %v648_v0 }
 0x64b   :  { %v849_v35 = vmul.f32 %v848_v34, %v776_v11 }
 0x650   :  { %v773_v9 = vpop.f32.mrf.mxu1 }
 0x651   :  { %v777_v10 = vadd.f32 %v773_v9, %v651_v8 }
 0x653   :  { %804 = vmatpush.msra.mxu2 %v777_v10  ;;  %v850_v38 = vmul.f32 %v848_v34, %v777_v10 }
 0x655   :  { %805 = vmatpush.msra.mxu2 %v776_v11 }
 0x656   :  { %1075 = vmatmul.msk.f32.vlgmr.msra.gmra.mxu2 %vm202_vm1, %v1357_v15  ;;  %v785_v15 = vpop.permute.xlu2 %784 }
 0x65e   :  { %1076 = vmatmul.msk.f32.gmra.mxu2 %vm202_vm1, %v1370_v20  ;;  %v783_v14 = vpop.permute.xlu2 %782 }
 0x666   :  { %1077 = vmatmul.msk.f32.gmra.mxu2 %vm202_vm1, %v1377_v23 }
 0x66e   :  { %1078 = vmatmul.msk.f32.gmra.mxu2 %vm202_vm1, %v1381_v24 }
 0x6d9   :  { %v807_v2 = vpop.f32.mrf.mxu2 }
 0x6da   :  { %v808_v22 = vadd.f32 %v807_v2, %v779_v21 }
 0x6dc   :  { %v819_v27 = vmax.f32 %v808_v22, 0.0 }
 0x6e1   :  { %v810_v5 = vpop.f32.mrf.mxu2 }
 0x6e2   :  { %v811_v24 = vadd.f32 %v810_v5, %v781_v18 }
 0x6e4   :  { %v820_v26 = vmax.f32 %v811_v24, 0.0 }
 0x6e9   :  { %v813_v20 = vpop.f32.mrf.mxu2 }
 0x6ea   :  { %v814_v23 = vadd.f32 %v813_v20, %v783_v14 }
 0x6ec   :  { %v821_v25 = vmax.f32 %v814_v23, 0.0 }
 0x6f1   :  { %v816_v16 = vpop.f32.mrf.mxu2 }
 0x6f2   :  { %v817_v17 = vadd.f32 %v816_v16, %v785_v15 }
 0x6f4   :  { %v822_v19 = vmax.f32 %v817_v17, 0.0 }
 0x6f6   :  { %835 = vmatpush.msrb.mxu0 %v822_v19 }
 0x6f8   :  { %836 = vmatpush.msrb.mxu0 %v821_v25 }
 0x6fa   :  { %837 = vmatpush.msrb.mxu0 %v820_v26 }
 0x6fc   :  { %838 = vmatpush.msrb.mxu0 %v819_v27 }
 0x6fd   :  { %1079 = vmatmul.msk.f32.vlgmr.msrb.gmra.mxu0 %vm248_vm2, %v1395_v43  ;;  %v1095_v43 = vld [vmem:[%s1709_s13 + $0xb0] sm:$0xff] }
 0x6fe   :  { %923 = vmatpush.msra.mxu1 %v1095_v43 }
 0x705   :  { %1080 = vmatmul.msk.f32.gmra.mxu0 %vm248_vm2, %v1399_v45  ;;  %v1094_v45 = vld [vmem:[%s1709_s13 + $0xa8] sm:$0xff] }
 0x706   :  { %924 = vmatpush.msra.mxu1 %v1094_v45 }
 0x708   :  { %925 = vmatpush.msra.mxu1 %v1093_v31 }
 0x70a   :  { %926 = vmatpush.msra.mxu1 %v1092_v33 }
 0x70c   :  { %927 = vmatpush.msra.mxu1 %v1091_v41 }
 0x70e   :  { %928 = vmatpush.msra.mxu1 %v1090_v42 }
 0x710   :  { %929 = vmatpush.msra.mxu1 %v1089_v44 }
 0x77a   :  { %v840_v36 = vpop.f32.mrf.mxu0 }
 0x77b   :  { %v851_v37 = vadd.f32 %v849_v35, %v840_v36 }
 0x77d   :  { %1087 = vmatmul.msk.f32.vlgmr.msrb.gmra.mxu3 %vm248_vm2, %v851_v37 }
 0x782   :  { %v843_v39 = vpop.f32.mrf.mxu0 }
 0x783   :  { %v852_v40 = vadd.f32 %v850_v38, %v843_v39 }
 0x785   :  { %1088 = vmatmul.msk.f32.gmra.mxu3 %vm248_vm2, %v852_v40 }
 0x800   :  { %v886_v47 = vpop.f32.mrf.mxu3 }
 0x801   :  { %v887_v48 = vadd.f32 %v1135_v46, %v886_v47 }
 0x803   :  { %v892_v49 = vmax.f32 %v887_v48, 0.0 }
 0x805   :  { %1098 = vmatmul.msk.f32.vlgmr.msra.gmra.mxu1 %vm336_vm3, %v892_v49 }
 0x808   :  { %v889_v50 = vpop.f32.mrf.mxu3 }
 0x809   :  { %v890_v51 = vadd.f32 %v1135_v46, %v889_v50 }
 0x80b   :  { %v893_v52 = vmax.f32 %v890_v51, 0.0 }
 0x80d   :  { %1099 = vmatmul.msk.f32.gmra.mxu1 %vm336_vm3, %v893_v52 }
 0x882   :  { %v931_v57 = vpop.f32.mrf.mxu1 }
 0x883   :  { %v932_v61 = vadd.f32 %v1136_v58, %v931_v57 }
 0x88a   :  { %v934_v59 = vpop.f32.mrf.mxu1 }
 0x88b   :  { %v935_v60 = vadd.f32 %v1136_v58, %v934_v59 }
 0x88d   :  { %951 = vmatpush.msra.mxu0 %v935_v60 }
 0x88f   :  { %952 = vmatpush.msra.mxu0 %v932_v61 }
 0x890   :  { %1100 = vmatmul.msk.f32.vlgmr.msra.gmra.mxu0 %vm202_vm1, %v1388_v32 }
 0x90d   :  { %v954_v62 = vpop.f32.mrf.mxu0 }
 0x90e   :  { %1101 = vmatmul.msk.f32.vlgmr.msra.gmra.mxu3 %vm248_vm2, %v954_v62 }
 0x991   :  { %v985_v1 = vpop.f32.mrf.mxu3 }
 0x992   :  { %v986_v3 = vadd.f32 %v1137_v63, %v985_v1 }
 0x994   :  { %988 = vst [vmem:[#allocation7] sm:$0xff] %v986_v3 }
 0x995   :  { %999 = dma.vmem_to_hbm [thread:$0]  %s995_s23, 128, %s997_s14, [#allocation3]  }
 0x996   :  { %1190 = dma.done.wait [#allocation3], 128  }
 0x997   :  { %1191 = vsyncadd [#allocation3], 4294967168 }
 0x998   :  { %1004 = vsyncpa [#allocation3], 1 }
 0x999   :  { %1005 = vsyncpa [#allocation4], 1 }
 0x99a   :  { %1006 = vsyncpa [#allocation6], 1 }

</bundles_post_ra>
